<compile_context>
chip_gen: v6e
topology: v6e:2x2x1
jax: 0.10.0
libtpu: 0.0.40
codegen_flags: <defaults>
</compile_context>

<pallas_src>
import math

import jax
import jax.numpy as jnp
from jax.experimental import pallas as pl
from jax.experimental.pallas import tpu as pltpu


def _mean_max_kernel(x_ref, o_ref):
    # x_ref: (tile_n, R, D) input tile; o_ref: (tile_n,) output slice.
    x = x_ref[...].astype(jnp.float32)
    inv_d = 1.0 / x_ref.shape[-1]                       # static scalar
    row_mean = jnp.sum(x, axis=-1) * inv_d              # mean over dim=-1 -> (tile_n, R)
    o_ref[...] = jnp.max(row_mean, axis=-1).astype(o_ref.dtype)  # max over dim=-1


def _choose_tile_n(n, r, d, itemsize, budget_bytes=12 * 1024 * 1024):
    # Largest divisor of n whose (tile_n, R, D) block stays within a VMEM
    # budget that double-buffers comfortably under the 32 MiB scoped default.
    per_row = max(1, r * d * itemsize)
    max_rows = max(1, budget_bytes // per_row)
    if n <= max_rows:
        return n
    t = int(max_rows)
    while n % t != 0:
        t -= 1
    return t


def mean_and_max(x):
    """Equivalent of nnMeanAndMax.forward: mean over dim=-1, then max over dim=-1."""
    if x.ndim < 2:
        raise ValueError("mean_and_max needs an input with at least 2 dims")
    lead = x.shape[:-2]
    R, D = x.shape[-2], x.shape[-1]
    N = math.prod(lead) if lead else 1
    x3 = x.reshape(N, R, D)

    tile_n = _choose_tile_n(N, R, D, x3.dtype.itemsize)
    num_tiles = N // tile_n

    out = pl.pallas_call(
        _mean_max_kernel,
        out_shape=jax.ShapeDtypeStruct((num_tiles, tile_n), x.dtype),
        grid=(num_tiles,),
        in_specs=[pl.BlockSpec((tile_n, R, D), lambda i: (i, 0, 0))],
        out_specs=pl.BlockSpec((None, tile_n), lambda i: (i, 0)),
        compiler_params=pltpu.CompilerParams(
            dimension_semantics=("parallel",)),
    )(x3)
    return out.reshape(lead)


if __name__ == "__main__":
    key = jax.random.PRNGKey(0)
    # Small deterministic input consistent with the module: any (..., R, D).
    x = jax.random.normal(key, (2, 4, 16, 16), jnp.float32)

    out = jax.jit(mean_and_max)(x)
    out = jax.block_until_ready(out)

    # Reference: mean over last dim, then max over the (new) last dim.
    ref = jnp.max(jnp.mean(x, axis=-1), axis=-1)
    assert out.shape == (2, 4), out.shape
    assert bool(jnp.all(jnp.isfinite(out)))
    assert bool(jnp.allclose(out, ref, atol=1e-5, rtol=1e-5))
    print("KERNEL_OK")
</pallas_src>

<mosaic_0001>
module attributes {stable_mosaic.version = 11 : i64} {
  func.func @_mean_max_kernel(%arg0: i32, %arg1: memref<8x16x16xf32, #tpu.memory_space<vmem>>, %arg2: memref<1x8xf32, #tpu.memory_space<vmem>>) attributes {dimension_semantics = [#tpu.dimension_semantics<parallel>], iteration_bounds = array<i64: 1>, scalar_prefetch = 0 : i64, scratch_operands = 0 : i64, tpu.core_type = #tpu.core_type<tc>, window_params = [{transform_indices = @transform_0, window_bounds = array<i64: 8, 16, 16>}, {transform_indices = @transform_1, window_bounds = array<i64: 1, 8>}]} {
    %c0 = arith.constant 0 : index
    %c0_0 = arith.constant 0 : index
    %c0_1 = arith.constant 0 : index
    %0 = vector.load %arg1[%c0, %c0_0, %c0_1] : memref<8x16x16xf32, #tpu.memory_space<vmem>>, vector<8x16x16xf32>
    %cst = arith.constant dense<0.000000e+00> : vector<8x16xf32>
    %1 = vector.multi_reduction <add>, %0, %cst [2] : vector<8x16x16xf32> to vector<8x16xf32>
    %cst_2 = arith.constant 6.250000e-02 : f32
    %2 = vector.broadcast %cst_2 : f32 to vector<8x16xf32>
    %3 = arith.mulf %1, %2 : vector<8x16xf32>
    %cst_3 = arith.constant dense<0xFF800000> : vector<8xf32>
    %4 = vector.multi_reduction <maximumf>, %3, %cst_3 [1] : vector<8x16xf32> to vector<8xf32>
    %c0_4 = arith.constant 0 : index
    %c0_5 = arith.constant 0 : index
    %5 = vector.load %arg2[%c0_4, %c0_5] : memref<1x8xf32, #tpu.memory_space<vmem>>, vector<1x8xf32>
    %6 = vector.shape_cast %5 : vector<1x8xf32> to vector<8xf32>
    %7 = vector.shape_cast %4 : vector<8xf32> to vector<1x8xf32>
    tpu.vector_store %arg2[%c0_4, %c0_5], %7 {strides = array<i32>} : memref<1x8xf32, #tpu.memory_space<vmem>>, vector<1x8xf32>,
    return
  }
  func.func @transform_0(%arg0: i32) -> (i32, i32, i32) {
    %c0_i32 = arith.constant 0 : i32
    %c0_i32_0 = arith.constant 0 : i32
    %c0_i32_1 = arith.constant 0 : i32
    return %arg0, %c0_i32, %c0_i32_0 : i32, i32, i32
  }
  func.func @transform_1(%arg0: i32) -> (i32, i32) {
    %c0_i32 = arith.constant 0 : i32
    %c0_i32_0 = arith.constant 0 : i32
    return %arg0, %c0_i32 : i32, i32
  }
}

</mosaic_0001>

<bundles_post_ra>
// kernel: mean_and_max.1
= control target key start
LH: loop header
LB: loop body
LE: loop exit
PB: predicated region body
PF: predicated region fallthrough
CT: control target
= control target key end

     0   :  { %6 = vsyncpa [#allocation3], 0  ;;  %s251_s6 = smov [#allocation2]   ;;  %s317_s0 = inlined_call_operand.hbm [shape: f32[8,16,16], index: 0, kind: input, shape index: {}]   ;;  %s318_s1 = inlined_call_operand.vmem [shape: f32[1,8], index: 1, kind: output, shape index: {}]  }
   0x1   :  { %s12_s7 = sshll.u32 %s251_s6, 4  ;;  %s13_s7 = int_to_ptr.vmem [resolvable:$true] %s12_s7 }
   0x2   :  { %s237_s8 = scalar_lea.vmem %s13_s7, 2048  ;;  %p242_p1 = scmp.lt.s32.totalorder %s13_s7, %s13_s7 }
   0x3   :  { %p238_p0 = scmp.ne.s32.totalorder %s13_s7, %s237_s8  ;;  %p243_p2 = scmp.lt.s32.totalorder %s237_s8, %s237_s8 }
   0x5   :  { %p244_p3 = por %p243_p2, %p242_p1 }
   0x7   :  { %p245_p4 = pnand %p244_p3, %p238_p0 }
   0x9   :  { %248 = shalt.err (!%p245_p4)
}
   0xa   :  { %s252_s9 = smov 128   ;;  %s253_s10 = smov 8  }
   0xb   :  { %18 = dma.hbm_to_vmem [thread:$0]  %s317_s0, 2048, %s13_s7, [#allocation3], %s252_s9, %s252_s9, %s253_s10  }
   0xc   :  { %249 = dma.done.wait [#allocation3], 2048  }
   0xd   :  { %250 = vsyncadd [#allocation3], 4294965248  ;;  %vm38_vm0 = vcmask 130048   ;;  %v24_v0 = vld [vmem:[#allocation2 + $0x10] sm:$0xff]  ;;  %v22_v1 = vld [vmem:[#allocation2] sm:$0xff]  ;;  %v119_v36 = vlaneseq  ;;  %vm130_vm1 = vcmask 130112  }
   0xe   :  { %v25_v2 = vld [vmem:[#allocation2 + $0x18] sm:$0xff]  ;;  %v45_v3 = vsel %vm38_vm0, %v24_v0, 0.0  ;;  %v39_v4 = vsel %vm38_vm0, %v22_v1, 0.0  ;;  %v23_v5 = vld [vmem:[#allocation2 + $0x8] sm:$0xff]  ;;  %v26_v9 = vld [vmem:[#allocation2 + $0x20] sm:$0xff]  ;;  %vm195_vm2 = vcmask 1041409  }
   0xf   :  { %46 = vadd.xlane.f32.xlu1 %v45_v3  ;;  %40 = vadd.xlane.f32.xlu0 %v39_v4  ;;  %v48_v6 = vsel %vm38_vm0, %v25_v2, 0.0  ;;  %v42_v7 = vsel %vm38_vm0, %v23_v5, 0.0  ;;  %v27_v8 = vld [vmem:[#allocation2 + $0x28] sm:$0xff]  ;;  %v51_v11 = vsel %vm38_vm0, %v26_v9, 0.0  ;;  %v29_v12 = vld [vmem:[#allocation2 + $0x38] sm:$0xff]  ;;  %v28_v13 = vld [vmem:[#allocation2 + $0x30] sm:$0xff] }
  0x10   :  { %v54_v10 = vsel %vm38_vm0, %v27_v8, 0.0  ;;  %v60_v14 = vsel %vm38_vm0, %v29_v12, 0.0  ;;  %v57_v15 = vsel %vm38_vm0, %v28_v13, 0.0  ;;  %v31_v16 = vld [vmem:[#allocation2 + $0x48] sm:$0xff]  ;;  %v30_v17 = vld [vmem:[#allocation2 + $0x40] sm:$0xff]  ;;  %v33_v20 = vld [vmem:[#allocation2 + $0x58] sm:$0xff] }
  0x11   :  { %v66_v18 = vsel %vm38_vm0, %v31_v16, 0.0  ;;  %v63_v19 = vsel %vm38_vm0, %v30_v17, 0.0  ;;  %v32_v21 = vld [vmem:[#allocation2 + $0x50] sm:$0xff]  ;;  %v72_v22 = vsel %vm38_vm0, %v33_v20, 0.0  ;;  %v35_v24 = vld [vmem:[#allocation2 + $0x68] sm:$0xff]  ;;  %v34_v25 = vld [vmem:[#allocation2 + $0x60] sm:$0xff] }
  0x12   :  { %v69_v23 = vsel %vm38_vm0, %v32_v21, 0.0  ;;  %v78_v26 = vsel %vm38_vm0, %v35_v24, 0.0  ;;  %v75_v27 = vsel %vm38_vm0, %v34_v25, 0.0  ;;  %v37_v28 = vld [vmem:[#allocation2 + $0x78] sm:$0xff]  ;;  %v36_v29 = vld [vmem:[#allocation2 + $0x70] sm:$0xff]  ;;  %v120_v39 = vand.u32 127, %v119_v36 }
  0x13   :  { %49 = vadd.xlane.f32.xlu1 %v48_v6  ;;  %43 = vadd.xlane.f32.xlu0 %v42_v7  ;;  %v84_v30 = vsel %vm38_vm0, %v37_v28, 0.0  ;;  %v81_v31 = vsel %vm38_vm0, %v36_v29, 0.0  ;;  %v122_v43 = vshrl.u32 %v119_v36, 7  ;;  %vm197_vm3 = vcmask 1042434  }
  0x14   :  { %v125_v40 = vadd.s32 4294967288, %v120_v39  ;;  %vm199_vm4 = vcmask 1043459   ;;  %vm201_vm5 = vcmask 1044484   ;;  %vm203_vm6 = vcmask 1045509  }
  0x15   :  { %v285_v49 = vsub.s32 %v120_v39, %v122_v43  ;;  %vm205_vm7 = vcmask 1046534   ;;  %vm207_vm8 = vcmask 1047559   ;;  %vm219_vm9 = vcmask 57344  }
  0x16   :  { %v283_v44 = vsub.s32 %v125_v40, %v122_v43 }
  0x17   :  { %55 = vadd.xlane.f32.xlu1 %v54_v10  ;;  %52 = vadd.xlane.f32.xlu0 %v51_v11 }
  0x1b   :  { %61 = vadd.xlane.f32.xlu1 %v60_v14  ;;  %58 = vadd.xlane.f32.xlu0 %v57_v15 }
  0x1f   :  { %67 = vadd.xlane.f32.xlu1 %v66_v18  ;;  %64 = vadd.xlane.f32.xlu0 %v63_v19 }
  0x23   :  { %73 = vadd.xlane.f32.xlu1 %v72_v22  ;;  %70 = vadd.xlane.f32.xlu0 %v69_v23 }
  0x27   :  { %79 = vadd.xlane.f32.xlu1 %v78_v26  ;;  %76 = vadd.xlane.f32.xlu0 %v75_v27 }
  0x2b   :  { %85 = vadd.xlane.f32.xlu1 %v84_v30  ;;  %82 = vadd.xlane.f32.xlu0 %v81_v31 }
  0x98   :  { %v47_v32 = vpop.xlane.xlu1 %46  ;;  %v41_v33 = vpop.xlane.xlu0 %40 }
  0x99   :  { %v89_v50 = vmul.f32 0.0625, %v47_v32  ;;  %v87_v51 = vmul.f32 0.0625, %v41_v33 }
  0x9b   :  { %v135_v0 = vrot.slane %v89_v50, %v285_v49  ;;  %v124_v1 = vrot.slane %v87_v51, %v285_v49 }
  0x9c   :  { %v50_v34 = vpop.xlane.xlu1 %49  ;;  %v44_v35 = vpop.xlane.xlu0 %43 }
  0x9d   :  { %v90_v45 = vmul.f32 0.0625, %v50_v34  ;;  %v88_v46 = vmul.f32 0.0625, %v44_v35 }
  0x9f   :  { %v139_v56 = vrot.slane %v90_v45, %v283_v44  ;;  %v129_v57 = vrot.slane %v88_v46, %v283_v44 }
  0xa0   :  { %v56_v37 = vpop.xlane.xlu1 %55  ;;  %v53_v38 = vpop.xlane.xlu0 %52 }
  0xa1   :  { %v92_v52 = vmul.f32 0.0625, %v56_v37  ;;  %v91_v53 = vmul.f32 0.0625, %v53_v38  ;;  %v140_v6 = vsel %vm130_vm1, %v139_v56, %v135_v0  ;;  %v131_v7 = vsel %vm130_vm1, %v129_v57, %v124_v1 }
  0xa2   :  { %v196_v20 = vsel %vm195_vm2, %v140_v6, %v131_v7 }
  0xa3   :  { %v148_v2 = vrot.slane %v92_v52, %v283_v44  ;;  %v144_v3 = vrot.slane %v91_v53, %v285_v49 }
  0xa4   :  { %v62_v41 = vpop.xlane.xlu1 %61  ;;  %v59_v42 = vpop.xlane.xlu0 %58 }
  0xa5   :  { %v94_v54 = vmul.f32 0.0625, %v62_v41  ;;  %v93_v55 = vmul.f32 0.0625, %v59_v42  ;;  %v149_v16 = vsel %vm130_vm1, %v148_v2, %v144_v3 }
  0xa6   :  { %v198_v24 = vsel %vm197_vm3, %v149_v16, %v196_v20 }
  0xa7   :  { %v157_v4 = vrot.slane %v94_v54, %v283_v44  ;;  %v153_v5 = vrot.slane %v93_v55, %v285_v49 }
  0xa8   :  { %v68_v47 = vpop.xlane.xlu1 %67  ;;  %v65_v48 = vpop.xlane.xlu0 %64 }
  0xa9   :  { %v96_v58 = vmul.f32 0.0625, %v68_v47  ;;  %v95_v59 = vmul.f32 0.0625, %v65_v48  ;;  %v158_v17 = vsel %vm130_vm1, %v157_v4, %v153_v5 }
  0xaa   :  { %v200_v28 = vsel %vm199_vm4, %v158_v17, %v198_v24 }
  0xab   :  { %v166_v8 = vrot.slane %v96_v58, %v283_v44  ;;  %v162_v9 = vrot.slane %v95_v59, %v285_v49 }
  0xac   :  { %v74_v60 = vpop.xlane.xlu1 %73  ;;  %v71_v61 = vpop.xlane.xlu0 %70 }
  0xad   :  { %v98_v62 = vmul.f32 0.0625, %v74_v60  ;;  %v97_v63 = vmul.f32 0.0625, %v71_v61  ;;  %v167_v21 = vsel %vm130_vm1, %v166_v8, %v162_v9 }
  0xae   :  { %v202_v32 = vsel %vm201_vm5, %v167_v21, %v200_v28 }
  0xaf   :  { %v175_v12 = vrot.slane %v98_v62, %v283_v44  ;;  %v171_v13 = vrot.slane %v97_v63, %v285_v49 }
  0xb0   :  { %v80_v10 = vpop.xlane.xlu1 %79  ;;  %v77_v11 = vpop.xlane.xlu0 %76 }
  0xb1   :  { %v100_v14 = vmul.f32 0.0625, %v80_v10  ;;  %v99_v15 = vmul.f32 0.0625, %v77_v11  ;;  %v176_v25 = vsel %vm130_vm1, %v175_v12, %v171_v13 }
  0xb2   :  { %v204_v33 = vsel %vm203_vm6, %v176_v25, %v202_v32 }
  0xb3   :  { %v184_v18 = vrot.slane %v100_v14, %v283_v44  ;;  %v180_v19 = vrot.slane %v99_v15, %v285_v49 }
  0xb4   :  { %v86_v22 = vpop.xlane.xlu1 %85  ;;  %v83_v23 = vpop.xlane.xlu0 %82 }
  0xb5   :  { %v102_v26 = vmul.f32 0.0625, %v86_v22  ;;  %v101_v27 = vmul.f32 0.0625, %v83_v23  ;;  %v185_v29 = vsel %vm130_vm1, %v184_v18, %v180_v19 }
  0xb6   :  { %v206_v35 = vsel %vm205_vm7, %v185_v29, %v204_v33 }
  0xb7   :  { %v193_v30 = vrot.slane %v102_v26, %v283_v44  ;;  %v189_v31 = vrot.slane %v101_v27, %v285_v49 }
  0xb9   :  { %v194_v34 = vsel %vm130_vm1, %v193_v30, %v189_v31 }
  0xba   :  { %v208_v36 = vsel %vm207_vm8, %v194_v34, %v206_v35 }
  0xbb   :  { %v210_v37 = vsel %vm38_vm0, %v208_v36, -inf }
  0xbc   :  { %211 = vmax.xlane.f32.xlu0 %v210_v37 }
 0x145   :  { %v212_v38 = vpop.xlane.xlu0 %211 }
 0x146   :  { %v217_v39 = vrot.slane %v212_v38, %v285_v49 }
 0x148   :  { %220 = vst.msk [vmem:[%s318_s1] sm:$0x1] %vm219_vm9, %v217_v39 }
 0x149   :  { %225 = vsyncpa [#allocation3], 1 }

</bundles_post_ra>
